<compile_context>
chip_gen: v6e
topology: v6e:2x2x1
jax: 0.10.0
libtpu: 0.0.40
codegen_flags: <defaults>
</compile_context>

<pallas_src>
import functools
import math

import jax
import jax.numpy as jnp
from jax import lax
from jax.experimental import pallas as pl
from jax.experimental.pallas import tpu as pltpu


# ----------------------------- config -----------------------------------------
class Config:
    transformer_hidden_size = 32
    qkv_hidden_size = 8
    multi_head_num = 4   # qkv_hidden_size * multi_head_num == transformer_hidden_size


# ----------------------------- fused Pallas kernel ------------------------------
def _mha_kernel(x_ref, wqkv_ref, bqkv_ref, wo_ref, bo_ref, bias_ref, o_ref,
                *, num_heads, compute_dtype):
    """One grid step == one batch element's full causal self-attention.

    x_ref:    (S, D)           f32 rows for this batch element
    wqkv_ref: (3*H, D, Dh)     head-major [q_heads | k_heads | v_heads], q pre-scaled
    bqkv_ref: (3*H, 1, Dh)     f32 biases (q bias pre-scaled)
    wo_ref:   (H, Dh, D)       output projection, head-major
    bo_ref:   (1, D)           f32
    bias_ref: (1, S, S)        additive causal bias (0 / -1e30)
    o_ref:    (S, D)           f32 output rows for this batch element
    """
    H = num_heads

    x = x_ref[...].astype(compute_dtype)                               # (S, D)

    # Fused QKV projection as ONE batched dot_general with heads on the batch axis:
    # no post-matmul head split / lane relayout is ever needed.
    xh = jnp.broadcast_to(x[None], (3 * H,) + x.shape)                  # (3H, S, D)
    qkv = lax.dot_general(
        xh, wqkv_ref[...],
        dimension_numbers=(((2,), (1,)), ((0,), (0,))),
        preferred_element_type=jnp.float32) + bqkv_ref[...]             # (3H, S, Dh) f32

    # Leading-dim slices: pure tile selection, no lane shuffle.
    q = qkv[0 * H:1 * H].astype(compute_dtype)                          # (H, S, Dh)
    k = qkv[1 * H:2 * H].astype(compute_dtype)                          # (H, S, Dh)
    v = qkv[2 * H:3 * H].astype(compute_dtype)                          # (H, S, Dh)

    # Scores (1/sqrt(Dh) already folded into Wq/bq at init).  Contract the LAST dims
    # with H as a batch dim -> no transposes.
    s = lax.dot_general(q, k, (((2,), (2,)), ((0,), (0,))),
                        preferred_element_type=jnp.float32)             # (H, S, S) f32
    s = s + bias_ref[...]                                               # causal additive bias

    # Numerically-stable softmax in f32; reciprocal on the EUP.
    m = jnp.max(s, axis=-1, keepdims=True)
    p = jnp.exp(s - m)
    p = p * pl.reciprocal(jnp.sum(p, axis=-1, keepdims=True), approx=True)

    # attn @ V, batched over heads.
    o = lax.dot_general(p.astype(compute_dtype), v,
                        (((2,), (1,)), ((0,), (0,))),
                        preferred_element_type=jnp.float32)             # (H, S, Dh)

    # Fold the output projection in per head (attn @ Wo == sum_h o_h @ Wo_h), then a
    # cheap leading-axis reduce merges heads -- the merged-head activation is never
    # materialized or re-laid-out.
    ctx = lax.dot_general(o.astype(compute_dtype), wo_ref[...],
                          (((2,), (1,)), ((0,), (0,))),
                          preferred_element_type=jnp.float32)           # (H, S, D)
    o_ref[...] = (jnp.sum(ctx, axis=0) + bo_ref[...]).astype(o_ref.dtype)


# ----------------------------- params ------------------------------------------
def init_params(config, key):
    """Torch-layout params: weights stored as (in, out) == W^T of nn.Linear."""
    D = config.transformer_hidden_size
    Dqkv = config.qkv_hidden_size * config.multi_head_num
    keys = jax.random.split(key, 8)
    std = 1.0 / math.sqrt(D)

    def lin(kw, kb, din, dout):
        w = jax.random.uniform(kw, (din, dout), jnp.float32, -std, std)
        b = jax.random.uniform(kb, (dout,), jnp.float32, -std, std)
        return w, b

    return {
        "q": lin(keys[0], keys[1], D, Dqkv),
        "k": lin(keys[2], keys[3], D, Dqkv),
        "v": lin(keys[4], keys[5], D, Dqkv),
        "o": lin(keys[6], keys[7], D, D),
    }


def prepare_kernel_params(params, config, compute_dtype=jnp.float32):
    """ONE-TIME (init-time) repack into the kernel's head-major fused layout.

    Folds the 1/sqrt(Dh) score scale into Wq/bq and concatenates Q/K/V along the
    head axis, so the per-call wrapper does zero weight preprocessing.
    """
    D = config.transformer_hidden_size
    H = config.multi_head_num
    Dh = config.qkv_hidden_size
    scale = 1.0 / math.sqrt(Dh)

    def heads_w(w):   # (D, H*Dh) -> (H, D, Dh)
        return jnp.transpose(w.reshape(D, H, Dh), (1, 0, 2))

    def heads_b(b):   # (H*Dh,) -> (H, 1, Dh)
        return b.reshape(H, 1, Dh)

    wq, bq = params["q"]
    wk, bk = params["k"]
    wv, bv = params["v"]
    wo, bo = params["o"]

    wqkv = jnp.concatenate(
        [heads_w(wq) * scale, heads_w(wk), heads_w(wv)], axis=0
    ).astype(compute_dtype)                                   # (3H, D, Dh)
    bqkv = jnp.concatenate(
        [heads_b(bq) * scale, heads_b(bk), heads_b(bv)], axis=0
    ).astype(jnp.float32)                                     # (3H, 1, Dh), biases stay f32
    wo_h = wo.reshape(H, Dh, D).astype(compute_dtype)         # (H, Dh, D)
    bo2d = bo.reshape(1, D).astype(jnp.float32)               # (1, D)
    return {"wqkv": wqkv, "bqkv": bqkv, "wo": wo_h, "bo": bo2d}


# ----------------------------- module forward ----------------------------------
def multi_head_attention(kparams, x, config, compute_dtype=jnp.float32):
    """Decoder self-attention path (encoder_output=None, attention_mask=None)."""
    B, S, D = x.shape
    H = config.multi_head_num
    Dh = config.qkv_hidden_size

    # x stays f32 at the pallas_call boundary (cast to compute_dtype inside the kernel).
    x2d = x.reshape(B * S, D)

    # Additive causal bias, built once per (jit-constant) S.  Diagonal always unmasked,
    # so -1e30 is safe (no fully-masked rows -> no NaNs).
    row = lax.broadcasted_iota(jnp.int32, (S, S), 0)
    col = lax.broadcasted_iota(jnp.int32, (S, S), 1)
    causal_bias = jnp.where(col <= row, 0.0, -1e30).astype(jnp.float32).reshape(1, S, S)

    kernel = functools.partial(_mha_kernel, num_heads=H, compute_dtype=compute_dtype)
    const3 = lambda b: (0, 0, 0)

    out = pl.pallas_call(
        kernel,
        grid=(B,),
        out_shape=jax.ShapeDtypeStruct((B * S, D), jnp.float32),
        in_specs=[
            pl.BlockSpec((S, D), lambda b: (b, 0)),            # per-batch token rows
            pl.BlockSpec((3 * H, D, Dh), const3),              # wqkv: VMEM-resident
            pl.BlockSpec((3 * H, 1, Dh), const3),              # bqkv: VMEM-resident
            pl.BlockSpec((H, Dh, D), const3),                  # wo:   VMEM-resident
            pl.BlockSpec((1, D), lambda b: (0, 0)),            # bo:   VMEM-resident
            pl.BlockSpec((1, S, S), const3),                   # causal bias: VMEM-resident
        ],
        out_specs=pl.BlockSpec((S, D), lambda b: (b, 0)),
        compiler_params=pltpu.CompilerParams(
            dimension_semantics=("parallel",)),                # shard batches across TCs
    )(x2d, kparams["wqkv"], kparams["bqkv"], kparams["wo"], kparams["bo"], causal_bias)

    return out.reshape(B, S, D)


# ----------------------------- reference (pure JAX, torch semantics) ------------
def reference(params, x, config):
    B, S, D = x.shape
    H, Dh = config.multi_head_num, config.qkv_hidden_size
    q = x @ params["q"][0] + params["q"][1]
    k = x @ params["k"][0] + params["k"][1]
    v = x @ params["v"][0] + params["v"][1]

    def heads(t):
        return t.reshape(B, S, H, Dh).transpose(0, 2, 1, 3)

    q, k, v = heads(q), heads(k), heads(v)
    s = jnp.einsum("bhqd,bhkd->bhqk", q, k) / math.sqrt(Dh)
    mask = jnp.tril(jnp.ones((S, S), bool))
    s = jnp.where(mask[None, None], s, -jnp.inf)
    p = jax.nn.softmax(s, axis=-1)
    o = jnp.einsum("bhqk,bhkd->bhqd", p, v)
    o = o.transpose(0, 2, 1, 3).reshape(B, S, H * Dh)
    return o @ params["o"][0] + params["o"][1]


# ----------------------------- main ---------------------------------------------
if __name__ == "__main__":
    config = Config()
    B, S = 2, 8
    D = config.transformer_hidden_size

    key = jax.random.PRNGKey(0)
    kx, kp = jax.random.split(key)
    x = jax.random.normal(kx, (B, S, D), jnp.float32)
    params = init_params(config, kp)
    ref = reference(params, x, config)

    # --- f32-operand path: tight correctness check (approx reciprocal ~1e-3 rel). ---
    kparams_f32 = prepare_kernel_params(params, config, compute_dtype=jnp.float32)
    out_f32 = jax.block_until_ready(multi_head_attention(
        kparams_f32, x, config, compute_dtype=jnp.float32))
    assert out_f32.shape == (B, S, D)
    err_f32 = float(jnp.max(jnp.abs(out_f32 - ref)))
    assert jnp.allclose(out_f32, ref, atol=2e-3, rtol=2e-3), (
        f"f32 path mismatch vs reference (max abs err {err_f32:.3e})")

    # --- bf16-operand path (recommended for v6e/v7x MXU): f32 accumulation, f32 softmax.
    # Tolerance is loose because the MXU operands are rounded to bf16 (~3 decimal digits).
    kparams_bf16 = prepare_kernel_params(params, config, compute_dtype=jnp.bfloat16)
    out_bf16 = jax.block_until_ready(multi_head_attention(
        kparams_bf16, x, config, compute_dtype=jnp.bfloat16))
    err_bf16 = float(jnp.max(jnp.abs(out_bf16 - ref)))
    assert jnp.allclose(out_bf16, ref, atol=1e-1, rtol=1e-1), (
        f"bf16 path mismatch vs reference (max abs err {err_bf16:.3e})")

    print("KERNEL_OK")
</pallas_src>

<mosaic_0001>
module attributes {stable_mosaic.version = 11 : i64} {
  func.func @_mha_kernel(%arg0: i32, %arg1: memref<8x32xf32, #tpu.memory_space<vmem>>, %arg2: memref<12x32x8xf32, #tpu.memory_space<vmem>>, %arg3: memref<12x1x8xf32, #tpu.memory_space<vmem>>, %arg4: memref<4x8x32xf32, #tpu.memory_space<vmem>>, %arg5: memref<1x32xf32, #tpu.memory_space<vmem>>, %arg6: memref<1x8x8xf32, #tpu.memory_space<vmem>>, %arg7: memref<8x32xf32, #tpu.memory_space<vmem>>) attributes {dimension_semantics = [#tpu.dimension_semantics<parallel>], iteration_bounds = array<i64: 2>, scalar_prefetch = 0 : i64, scratch_operands = 0 : i64, tpu.core_type = #tpu.core_type<tc>, window_params = [{transform_indices = @transform_0, window_bounds = array<i64: 8, 32>}, {pipeline_mode = #tpu.pipeline_mode<synchronous>, transform_indices = @transform_1, window_bounds = array<i64: 12, 32, 8>}, {pipeline_mode = #tpu.pipeline_mode<synchronous>, transform_indices = @transform_2, window_bounds = array<i64: 12, 1, 8>}, {pipeline_mode = #tpu.pipeline_mode<synchronous>, transform_indices = @transform_3, window_bounds = array<i64: 4, 8, 32>}, {pipeline_mode = #tpu.pipeline_mode<synchronous>, transform_indices = @transform_4, window_bounds = array<i64: 1, 32>}, {pipeline_mode = #tpu.pipeline_mode<synchronous>, transform_indices = @transform_5, window_bounds = array<i64: 1, 8, 8>}, {transform_indices = @transform_6, window_bounds = array<i64: 8, 32>}]} {
    %c0 = arith.constant 0 : index
    %c0_0 = arith.constant 0 : index
    %0 = vector.load %arg1[%c0, %c0_0] : memref<8x32xf32, #tpu.memory_space<vmem>>, vector<8x32xf32>
    %1 = vector.shape_cast %0 : vector<8x32xf32> to vector<1x8x32xf32>
    %2 = vector.shape_cast %1 : vector<1x8x32xf32> to vector<1x8x32xf32>
    %3 = vector.broadcast %2 : vector<1x8x32xf32> to vector<12x8x32xf32>
    %c0_1 = arith.constant 0 : index
    %c0_2 = arith.constant 0 : index
    %c0_3 = arith.constant 0 : index
    %4 = vector.load %arg2[%c0_1, %c0_2, %c0_3] : memref<12x32x8xf32, #tpu.memory_space<vmem>>, vector<12x32x8xf32>
    %cst = arith.constant dense<0.000000e+00> : vector<12x8x8xf32>
    %5 = tpu.matmul %3, %4, %cst {dimension_numbers = #tpu.dot_dimension_numbers<[2], [1], [1], [2], [0, 0, 0, 1, 1, 2], [0], [0]>} : vector<12x8x32xf32>, vector<12x32x8xf32>, vector<12x8x8xf32> -> vector<12x8x8xf32>
    %c0_4 = arith.constant 0 : index
    %c0_5 = arith.constant 0 : index
    %c0_6 = arith.constant 0 : index
    %6 = vector.load %arg3[%c0_4, %c0_5, %c0_6] : memref<12x1x8xf32, #tpu.memory_space<vmem>>, vector<12x1x8xf32>
    %7 = vector.broadcast %6 : vector<12x1x8xf32> to vector<12x8x8xf32>
    %8 = arith.addf %5, %7 : vector<12x8x8xf32>
    %9 = vector.extract_strided_slice %8 {offsets = [0, 0, 0], sizes = [4, 8, 8], strides = [1, 1, 1]} : vector<12x8x8xf32> to vector<4x8x8xf32>
    %10 = vector.extract_strided_slice %8 {offsets = [4, 0, 0], sizes = [4, 8, 8], strides = [1, 1, 1]} : vector<12x8x8xf32> to vector<4x8x8xf32>
    %11 = vector.extract_strided_slice %8 {offsets = [8, 0, 0], sizes = [4, 8, 8], strides = [1, 1, 1]} : vector<12x8x8xf32> to vector<4x8x8xf32>
    %cst_7 = arith.constant dense<0.000000e+00> : vector<4x8x8xf32>
    %12 = tpu.matmul %9, %10, %cst_7 {dimension_numbers = #tpu.dot_dimension_numbers<[2], [2], [1], [1], [0, 0, 0, 1, 1, 1], [0], [0]>} : vector<4x8x8xf32>, vector<4x8x8xf32>, vector<4x8x8xf32> -> vector<4x8x8xf32>
    %c0_8 = arith.constant 0 : index
    %c0_9 = arith.constant 0 : index
    %c0_10 = arith.constant 0 : index
    %13 = vector.load %arg6[%c0_8, %c0_9, %c0_10] : memref<1x8x8xf32, #tpu.memory_space<vmem>>, vector<1x8x8xf32>
    %14 = vector.broadcast %13 : vector<1x8x8xf32> to vector<4x8x8xf32>
    %15 = arith.addf %12, %14 : vector<4x8x8xf32>
    %cst_11 = arith.constant dense<0xFF800000> : vector<4x8xf32>
    %16 = vector.multi_reduction <maximumf>, %15, %cst_11 [2] : vector<4x8x8xf32> to vector<4x8xf32>
    %17 = vector.shape_cast %16 : vector<4x8xf32> to vector<4x8x1xf32>
    %18 = vector.broadcast %17 : vector<4x8x1xf32> to vector<4x8x8xf32>
    %19 = arith.subf %15, %18 : vector<4x8x8xf32>
    %20 = math.exp %19 : vector<4x8x8xf32>
    %cst_12 = arith.constant dense<0.000000e+00> : vector<4x8xf32>
    %21 = vector.multi_reduction <add>, %20, %cst_12 [2] : vector<4x8x8xf32> to vector<4x8xf32>
    %22 = vector.shape_cast %21 : vector<4x8xf32> to vector<4x8x1xf32>
    %23 = tpu.reciprocal %22 {approx = true} : vector<4x8x1xf32> -> vector<4x8x1xf32>
    %24 = vector.broadcast %23 : vector<4x8x1xf32> to vector<4x8x8xf32>
    %25 = arith.mulf %20, %24 : vector<4x8x8xf32>
    %cst_13 = arith.constant dense<0.000000e+00> : vector<4x8x8xf32>
    %26 = tpu.matmul %25, %11, %cst_13 {dimension_numbers = #tpu.dot_dimension_numbers<[2], [1], [1], [2], [0, 0, 0, 1, 1, 2], [0], [0]>} : vector<4x8x8xf32>, vector<4x8x8xf32>, vector<4x8x8xf32> -> vector<4x8x8xf32>
    %c0_14 = arith.constant 0 : index
    %c0_15 = arith.constant 0 : index
    %c0_16 = arith.constant 0 : index
    %27 = vector.load %arg4[%c0_14, %c0_15, %c0_16] : memref<4x8x32xf32, #tpu.memory_space<vmem>>, vector<4x8x32xf32>
    %cst_17 = arith.constant dense<0.000000e+00> : vector<4x8x32xf32>
    %28 = tpu.matmul %26, %27, %cst_17 {dimension_numbers = #tpu.dot_dimension_numbers<[2], [1], [1], [2], [0, 0, 0, 1, 1, 2], [0], [0]>} : vector<4x8x8xf32>, vector<4x8x32xf32>, vector<4x8x32xf32> -> vector<4x8x32xf32>
    %cst_18 = arith.constant dense<0.000000e+00> : vector<8x32xf32>
    %29 = vector.multi_reduction <add>, %28, %cst_18 [0] : vector<4x8x32xf32> to vector<8x32xf32>
    %c0_19 = arith.constant 0 : index
    %c0_20 = arith.constant 0 : index
    %30 = vector.load %arg5[%c0_19, %c0_20] : memref<1x32xf32, #tpu.memory_space<vmem>>, vector<1x32xf32>
    %31 = vector.broadcast %30 : vector<1x32xf32> to vector<8x32xf32>
    %32 = arith.addf %29, %31 : vector<8x32xf32>
    %c0_21 = arith.constant 0 : index
    %c0_22 = arith.constant 0 : index
    %33 = vector.load %arg7[%c0_21, %c0_22] : memref<8x32xf32, #tpu.memory_space<vmem>>, vector<8x32xf32>
    tpu.vector_store %arg7[%c0_21, %c0_22], %32 {strides = array<i32>} : memref<8x32xf32, #tpu.memory_space<vmem>>, vector<8x32xf32>,
    return
  }
  func.func @transform_0(%arg0: i32) -> (i32, i32) {
    %c0_i32 = arith.constant 0 : i32
    %c0_i32_0 = arith.constant 0 : i32
    return %arg0, %c0_i32 : i32, i32
  }
  func.func @transform_1(%arg0: i32) -> (i32, i32, i32) {
    %c0_i32 = arith.constant 0 : i32
    %c0_i32_0 = arith.constant 0 : i32
    %c0_i32_1 = arith.constant 0 : i32
    %c0_i32_2 = arith.constant 0 : i32
    return %c0_i32, %c0_i32_0, %c0_i32_1 : i32, i32, i32
  }
  func.func @transform_2(%arg0: i32) -> (i32, i32, i32) {
    %c0_i32 = arith.constant 0 : i32
    %c0_i32_0 = arith.constant 0 : i32
    %c0_i32_1 = arith.constant 0 : i32
    %c0_i32_2 = arith.constant 0 : i32
    return %c0_i32, %c0_i32_0, %c0_i32_1 : i32, i32, i32
  }
  func.func @transform_3(%arg0: i32) -> (i32, i32, i32) {
    %c0_i32 = arith.constant 0 : i32
    %c0_i32_0 = arith.constant 0 : i32
    %c0_i32_1 = arith.constant 0 : i32
    %c0_i32_2 = arith.constant 0 : i32
    return %c0_i32, %c0_i32_0, %c0_i32_1 : i32, i32, i32
  }
  func.func @transform_4(%arg0: i32) -> (i32, i32) {
    %c0_i32 = arith.constant 0 : i32
    %c0_i32_0 = arith.constant 0 : i32
    %c0_i32_1 = arith.constant 0 : i32
    return %c0_i32, %c0_i32_0 : i32, i32
  }
  func.func @transform_5(%arg0: i32) -> (i32, i32, i32) {
    %c0_i32 = arith.constant 0 : i32
    %c0_i32_0 = arith.constant 0 : i32
    %c0_i32_1 = arith.constant 0 : i32
    %c0_i32_2 = arith.constant 0 : i32
    return %c0_i32, %c0_i32_0, %c0_i32_1 : i32, i32, i32
  }
  func.func @transform_6(%arg0: i32) -> (i32, i32) {
    %c0_i32 = arith.constant 0 : i32
    %c0_i32_0 = arith.constant 0 : i32
    return %arg0, %c0_i32 : i32, i32
  }
}

</mosaic_0001>

<bundles_post_ra>
// kernel: tpu_custom_call.1
= control target key start
LH: loop header
LB: loop body
LE: loop exit
PB: predicated region body
PF: predicated region fallthrough
CT: control target
= control target key end

     0   :  { %11 = vsyncpa [#allocation3], 0  ;;  %s3189_s0 = inlined_call_operand.vmem [shape: f32[16,32], index: 0, kind: input, shape index: {}]   ;;  %s3190_s1 = inlined_call_operand.vmem [shape: f32[12,32,8], index: 1, kind: input, shape index: {}]   ;;  %s3191_s2 = inlined_call_operand.vmem [shape: f32[12,1,8], index: 2, kind: input, shape index: {}]   ;;  %s3192_s3 = inlined_call_operand.vmem [shape: f32[4,8,32], index: 3, kind: input, shape index: {}]   ;;  %s3193_s4 = inlined_call_operand.vmem [shape: f32[1,32], index: 4, kind: input, shape index: {}]   ;;  %s3194_s5 = inlined_call_operand.vmem [shape: f32[1,8,8], index: 5, kind: input, shape index: {}]   ;;  %s3195_s6 = inlined_call_operand.hbm [shape: f32[16,32], index: 6, kind: output, shape index: {}]  }
   0x1   :  { %13 = vsyncpa [#allocation3 + $0x1], 0  ;;  %s2735_s21 = smov 0   ;;  %s2737_s22 = smov 0  }
   0x2   :  { %s2739_s23 = smov 0   ;;  %s2741_s24 = smov 0  }
   0x3 LB: > { %s2756_s25 = sadd.s32 4294967295, %s2695_s24   ;;  %s2251_s26 = sadd.s32 4294967294, %s2695_s24   ;;  %s2695_s24 = sphi %s2741_s24, %s3201_s24   ;;  %s2691_s23 = sphi %s2739_s23, %s3200_s23   ;;  %s2687_s22 = sphi %s2737_s22, %s3199_s22   ;;  %s2683_s21 = sphi %s2735_s21, %s3198_s21  }
   0x4   : > { %s2760_s27 = sadd.s32 1, %s2695_s24   ;;  %s157_s28 = sadd.s32 1, %s2691_s23 }
   0x5   : > { %s154_s29 = ssub.s32 %s2695_s24, %s2760_s27  ;;  %p167_p0 = scmp.ne.s32.totalorder %s2691_s23, %s2687_s22 }
   0x6   : > { %p155_p1 = scmp.eq.s32.totalorder %s154_s29, 0  ;;  %p168_p2 = scmp.eq.s32.totalorder %s2756_s25, 1 }
   0x7   : > { %p173_p3 = scmp.ne.s32.totalorder %s2687_s22, %s2683_s21  ;;  %p174_p4 = scmp.eq.s32.totalorder %s2251_s26, 1 }
   0x8   : > { %s2771_s30 = scalar_select %p155_p1, %s2691_s23, %s157_s28  }
   0x9   : > { %p2773_p5 = por %p168_p2, %p167_p0  ;;  %p2777_p6 = por %p174_p4, %p173_p3 }
   0xa   : > { %p2254_p7 = scmp.ge.s32.totalorder %s2695_s24, 1  ;;  %p214_p8 = scmp.lt.s32.totalorder %s2695_s24, 3 }
   0xc   : > { %p215_p9 = pnand %p2254_p7, %p214_p8 }
   0xd   : > { %p243_p10 = scmp.lt.s32.totalorder (!%p215_p9), %s2756_s25, 1  ;;  %s240_s9 = sand.u32 (!%p215_p9), 1, %s2687_s22  }
   0xe   : > { %218 = sbr.rel (%p215_p9) target bundleno = 1172 (0x494), region = 44  ;;  %s2255_s10 = sshll.u32 (!%p215_p9), %s240_s9, 3 }
   0xf   : > { %s2299_s13 = sshll.u32 (!%p215_p9), %s2756_s25, 7  ;;  %s242_s14 = scalar_lea.vmem (!%p215_p9), [#allocation2], %s2255_s10 }
  0x10   : > { %s2192_s15 = sshll.u32 (!%p215_p9), %s242_s14, 4  ;;  %s2190_s18 = scalar_lea.hbm (!%p215_p9), %s3195_s6, %s2299_s13  ;;  %s2193_s15 = int_to_ptr.vmem [resolvable:$true] %s2192_s15 }
  0x11   : > { %s2179_s19 = scalar_lea.sflag (!%p215_p9), [#allocation3], %s240_s9  ;;  %s2635_s20 = scalar_lea.vmem (!%p215_p9), %s2193_s15, 128 }
  0x12   : > { %p2636_p11 = scmp.ne.s32.totalorder (!%p215_p9), %s2193_s15, %s2635_s20  ;;  %s2699_s26 = smov (!%p215_p9), [#allocation2]  }
  0x13   : > { %v251_v0 = vld [vmem:[%s3190_s1 + $0x18] sm:$0xff]  ;;  %v2697_v2 = vmov 0.0   ;;  %v250_v3 = vld [vmem:[%s3190_s1 + $0x10] sm:$0xff]  ;;  %s244_s17 = scalar_select %p243_p10, %s2756_s25, 1  ;;  %v249_v5 = vld [vmem:[%s3190_s1 + $0x8] sm:$0xff]  ;;  %vm380_vm0 = vcmask 261120  }
  0x14   : > { %v255_v1 = vld [vmem:[%s3190_s1 + $0x38] sm:$0xff]  ;;  %2386 = vmatprep.subr.mxu0 %v2697_v2  ;;  %2397 = vmatprep.subr.mxu1 %v2697_v2  ;;  %v254_v4 = vld [vmem:[%s3190_s1 + $0x30] sm:$0xff]  ;;  %v253_v6 = vld [vmem:[%s3190_s1 + $0x28] sm:$0xff]  ;;  %vm2698_vm1 = vmmov 0   ;;  %vm1225_vm2 = vcmask 64512   ;;  %p2637_p12 = pnand %p2636_p11, %p2773_p5  ;;  %s2639_s25 = sshll.u32 %s2699_s26, 4  ;;  %s2640_s25 = int_to_ptr.vmem [resolvable:$false] %s2639_s25 }
  0x15   : > { %2387 = vmatpush3.msra.mxu0 %v251_v0  ;;  %2398 = vmatpush3.msra.mxu1 %v255_v1  ;;  %s2256_s28 = sshll.u32 %s244_s17, 3  ;;  %v248_v7 = vld [vmem:[%s3190_s1] sm:$0xff]  ;;  %v259_v10 = vld [vmem:[%s3190_s1 + $0x58] sm:$0xff]  ;;  %v258_v12 = vld [vmem:[%s3190_s1 + $0x50] sm:$0xff]  ;;  %p2642_p0 = scmp.lt.s32.totalorder %s2193_s15, %s2640_s25 }
  0x16   : > { %2388 = vmatprep.subr.mxu0 %v2697_v2  ;;  %2399 = vmatprep.subr.mxu1 %v2697_v2  ;;  %s246_s12 = scalar_lea.vmem %s3189_s0, %s2256_s28  ;;  %v252_v8 = vld [vmem:[%s3190_s1 + $0x20] sm:$0xff]  ;;  %v263_v11 = vld [vmem:[%s3190_s1 + $0x78] sm:$0xff]  ;;  %v262_v13 = vld [vmem:[%s3190_s1 + $0x70] sm:$0xff]  ;;  %p2638_p13 = pneg %p2637_p12 }
  0x17   : > { %2389 = vmatpush3.msra.mxu0 %v250_v3  ;;  %2400 = vmatpush3.msra.mxu1 %v254_v4  ;;  %v2818_v9 = vld [vmem:[%s246_s12] sm:$0xff]  ;;  %v257_v14 = vld [vmem:[%s3190_s1 + $0x48] sm:$0xff]  ;;  %v267_v18 = vld [vmem:[%s3190_s1 + $0x98] sm:$0xff]  ;;  %s2641_s28 = scalar_lea.vmem %s2640_s25, 256 }
  0x18   : > { %2390 = vmatprep.subr.mxu0 %v2697_v2  ;;  %2401 = vmatprep.subr.mxu1 %v2697_v2  ;;  %v261_v15 = vld [vmem:[%s3190_s1 + $0x68] sm:$0xff]  ;;  %v256_v16 = vld [vmem:[%s3190_s1 + $0x40] sm:$0xff]  ;;  %v271_v19 = vld [vmem:[%s3190_s1 + $0xb8] sm:$0xff]  ;;  %p2643_p1 = scmp.lt.s32.totalorder %s2641_s28, %s2635_s20 }
  0x19   : > { %2391 = vmatpush3.msra.mxu0 %v249_v5  ;;  %2402 = vmatpush3.msra.mxu1 %v253_v6  ;;  %v260_v17 = vld [vmem:[%s3190_s1 + $0x60] sm:$0xff]  ;;  %v266_v20 = vld [vmem:[%s3190_s1 + $0x90] sm:$0xff]  ;;  %v265_v22 = vld [vmem:[%s3190_s1 + $0x88] sm:$0xff] }
  0x1a   : > { %2392 = vmatprep.subr.mxu0 %v2697_v2  ;;  %2403 = vmatprep.subr.mxu1 %v2697_v2  ;;  %v270_v21 = vld [vmem:[%s3190_s1 + $0xb0] sm:$0xff]  ;;  %v269_v23 = vld [vmem:[%s3190_s1 + $0xa8] sm:$0xff]  ;;  %v264_v24 = vld [vmem:[%s3190_s1 + $0x80] sm:$0xff]  ;;  %p2644_p2 = por %p2643_p1, %p2642_p0 }
  0x1b   : > { %2393 = vmatpush3.msra.mxu0 %v248_v7  ;;  %2394 = vmatprep.mubr.msk.f32.mxu0 %vm2698_vm1, %v2697_v2  ;;  %v268_v25 = vld [vmem:[%s3190_s1 + $0xa0] sm:$0xff]  ;;  %v275_v26 = vld [vmem:[%s3190_s1 + $0xd8] sm:$0xff]  ;;  %v274_v28 = vld [vmem:[%s3190_s1 + $0xd0] sm:$0xff] }
  0x1c   : > { %2404 = vmatpush3.msra.mxu1 %v252_v8  ;;  %2395 = vmatmul.mubr.msk.f32.vlgmr.msra.gmra.mxu0 %vm380_vm0, %v2818_v9  ;;  %v279_v27 = vld [vmem:[%s3190_s1 + $0xf8] sm:$0xff]  ;;  %v278_v29 = vld [vmem:[%s3190_s1 + $0xf0] sm:$0xff]  ;;  %v273_v30 = vld [vmem:[%s3190_s1 + $0xc8] sm:$0xff]  ;;  %p2645_p3 = pnand %p2644_p2, %p2638_p13 }
  0x1d   : > { %2405 = vmatprep.mubr.msk.f32.mxu1 %vm2698_vm1, %v2697_v2  ;;  %2408 = vmatprep.subr.mxu0 %v2697_v2  ;;  %v277_v31 = vld [vmem:[%s3190_s1 + $0xe8] sm:$0xff]  ;;  %v272_v32 = vld [vmem:[%s3190_s1 + $0xc0] sm:$0xff]  ;;  %v283_v34 = vld [vmem:[%s3190_s1 + $0x118] sm:$0xff] }
  0x1e   : > { %2419 = vmatprep.subr.mxu1 %v2697_v2  ;;  %2406 = vmatmul.mubr.msk.f32.vlgmr.msra.gmra.mxu1 %vm380_vm0, %v2818_v9  ;;  %v276_v33 = vld [vmem:[%s3190_s1 + $0xe0] sm:$0xff]  ;;  %v287_v35 = vld [vmem:[%s3190_s1 + $0x138] sm:$0xff]  ;;  %v282_v36 = vld [vmem:[%s3190_s1 + $0x110] sm:$0xff] }
  0x1f   : > { %2409 = vmatpush3.msra.mxu0 %v259_v10  ;;  %2420 = vmatpush3.msra.mxu1 %v263_v11  ;;  %v286_v37 = vld [vmem:[%s3190_s1 + $0x130] sm:$0xff]  ;;  %v281_v38 = vld [vmem:[%s3190_s1 + $0x108] sm:$0xff]  ;;  %v280_v40 = vld [vmem:[%s3190_s1 + $0x100] sm:$0xff] }
  0x20   : > { %2410 = vmatprep.subr.mxu0 %v2697_v2  ;;  %2421 = vmatprep.subr.mxu1 %v2697_v2  ;;  %v285_v39 = vld [vmem:[%s3190_s1 + $0x128] sm:$0xff]  ;;  %v284_v41 = vld [vmem:[%s3190_s1 + $0x120] sm:$0xff]  ;;  %v291_v42 = vld [vmem:[%s3190_s1 + $0x158] sm:$0xff] }
  0x21   : > { %2411 = vmatpush3.msra.mxu0 %v258_v12  ;;  %2422 = vmatpush3.msra.mxu1 %v262_v13  ;;  %v295_v43 = vld [vmem:[%s3190_s1 + $0x178] sm:$0xff]  ;;  %v290_v44 = vld [vmem:[%s3190_s1 + $0x150] sm:$0xff]  ;;  %v289_v46 = vld [vmem:[%s3190_s1 + $0x148] sm:$0xff] }
  0x22   : > { %2412 = vmatprep.subr.mxu0 %v2697_v2  ;;  %2423 = vmatprep.subr.mxu1 %v2697_v2  ;;  %v294_v45 = vld [vmem:[%s3190_s1 + $0x170] sm:$0xff]  ;;  %v293_v47 = vld [vmem:[%s3190_s1 + $0x168] sm:$0xff]  ;;  %v288_v48 = vld [vmem:[%s3190_s1 + $0x140] sm:$0xff] }
  0x23   : > { %2413 = vmatpush3.msra.mxu0 %v257_v14  ;;  %2424 = vmatpush3.msra.mxu1 %v261_v15  ;;  %v292_v49 = vld [vmem:[%s3190_s1 + $0x160] sm:$0xff] }
  0x24   : > { %2414 = vmatprep.subr.mxu0 %v2697_v2  ;;  %2425 = vmatprep.subr.mxu1 %v2697_v2  ;;  %v2261_v58 = vld [vmem:[%s3191_s2 + $0x4] ss:$0 sm:$0xff]  ;;  %v2262_v59 = vld [vmem:[%s3191_s2 + $0x5] ss:$0 sm:$0xff]  ;;  %v2257_v62 = vld [vmem:[%s3191_s2] ss:$0 sm:$0xff] }
  0x25   : > { %2415 = vmatpush3.msra.mxu0 %v256_v16  ;;  %2416 = vmatprep.mubr.msk.f32.mxu0 %vm2698_vm1, %v2697_v2  ;;  %v2258_v63 = vld [vmem:[%s3191_s2 + $0x1] ss:$0 sm:$0xff]  ;;  %v2263_v7 = vld [vmem:[%s3191_s2 + $0x6] ss:$0 sm:$0xff]  ;;  %v2264_v8 = vld [vmem:[%s3191_s2 + $0x7] ss:$0 sm:$0xff] }
  0x26   : > { %2426 = vmatpush3.msra.mxu1 %v260_v17  ;;  %2417 = vmatmul.mubr.msk.f32.vlgmr.msra.gmra.mxu0 %vm380_vm0, %v2818_v9  ;;  %v2259_v11 = vld [vmem:[%s3191_s2 + $0x2] ss:$0 sm:$0xff]  ;;  %v2260_v12 = vld [vmem:[%s3191_s2 + $0x3] ss:$0 sm:$0xff] }
  0x27   : > { %2427 = vmatprep.mubr.msk.f32.mxu1 %vm2698_vm1, %v2697_v2  ;;  %2430 = vmatprep.subr.mxu0 %v2697_v2 }
  0x28   : > { %2441 = vmatprep.subr.mxu1 %v2697_v2  ;;  %2428 = vmatmul.mubr.msk.f32.vlgmr.msra.gmra.mxu1 %vm380_vm0, %v2818_v9 }
  0x29   : > { %2431 = vmatpush3.msra.mxu0 %v267_v18  ;;  %2442 = vmatpush3.msra.mxu1 %v271_v19  ;;  %v2265_v19 = vld [vmem:[%s3191_s2 + $0x8] ss:$0 sm:$0xff] }
  0x2a   : > { %2432 = vmatprep.subr.mxu0 %v2697_v2  ;;  %2443 = vmatprep.subr.mxu1 %v2697_v2 }
  0x2b   : > { %2433 = vmatpush3.msra.mxu0 %v266_v20  ;;  %2444 = vmatpush3.msra.mxu1 %v270_v21  ;;  %v2266_v20 = vld [vmem:[%s3191_s2 + $0x9] ss:$0 sm:$0xff] }
  0x2c   : > { %2434 = vmatprep.subr.mxu0 %v2697_v2  ;;  %2445 = vmatprep.subr.mxu1 %v2697_v2 }
  0x2d   : > { %2435 = vmatpush3.msra.mxu0 %v265_v22  ;;  %2446 = vmatpush3.msra.mxu1 %v269_v23 }
  0x2e   : > { %2436 = vmatprep.subr.mxu0 %v2697_v2  ;;  %2447 = vmatprep.subr.mxu1 %v2697_v2 }
  0x2f   : > { %2437 = vmatpush3.msra.mxu0 %v264_v24  ;;  %2438 = vmatprep.mubr.msk.f32.mxu0 %vm2698_vm1, %v2697_v2 }
  0x30   : > { %2448 = vmatpush3.msra.mxu1 %v268_v25  ;;  %2449 = vmatprep.mubr.msk.f32.mxu1 %vm2698_vm1, %v2697_v2 }
  0x31   : > { %2439 = vmatmul.mubr.msk.f32.vlgmr.msra.gmra.mxu0 %vm380_vm0, %v2818_v9  ;;  %2450 = vmatmul.mubr.msk.f32.vlgmr.msra.gmra.mxu1 %vm380_vm0, %v2818_v9 }
  0x32   : > { %2452 = vmatprep.subr.mxu0 %v2697_v2  ;;  %2463 = vmatprep.subr.mxu1 %v2697_v2 }
  0x33   : > { %2453 = vmatpush3.msra.mxu0 %v275_v26  ;;  %2464 = vmatpush3.msra.mxu1 %v279_v27 }
  0x34   : > { %2454 = vmatprep.subr.mxu0 %v2697_v2  ;;  %2465 = vmatprep.subr.mxu1 %v2697_v2 }
  0x35   : > { %2455 = vmatpush3.msra.mxu0 %v274_v28  ;;  %2466 = vmatpush3.msra.mxu1 %v278_v29 }
  0x36   : > { %2456 = vmatprep.subr.mxu0 %v2697_v2  ;;  %2467 = vmatprep.subr.mxu1 %v2697_v2 }
  0x37   : > { %2457 = vmatpush3.msra.mxu0 %v273_v30  ;;  %2468 = vmatpush3.msra.mxu1 %v277_v31  ;;  %v1224_v31 = vld [vmem:[%s3194_s5] sm:$0xff] }
  0x38   : > { %2458 = vmatprep.subr.mxu0 %v2697_v2  ;;  %2469 = vmatprep.subr.mxu1 %v2697_v2 }
  0x39   : > { %2459 = vmatpush3.msra.mxu0 %v272_v32  ;;  %2460 = vmatprep.mubr.msk.f32.mxu0 %vm2698_vm1, %v2697_v2 }
  0x3a   : > { %2470 = vmatpush3.msra.mxu1 %v276_v33  ;;  %2471 = vmatprep.mubr.msk.f32.mxu1 %vm2698_vm1, %v2697_v2 }
  0x3b   : > { %2461 = vmatmul.mubr.msk.f32.vlgmr.msra.gmra.mxu0 %vm380_vm0, %v2818_v9  ;;  %2472 = vmatmul.mubr.msk.f32.vlgmr.msra.gmra.mxu1 %vm380_vm0, %v2818_v9 }
  0x3c   : > { %2474 = vmatprep.subr.mxu0 %v2697_v2  ;;  %2485 = vmatprep.subr.mxu1 %v2697_v2 }
  0x3d   : > { %2482 = vmatprep.mubr.msk.f32.mxu0 %vm2698_vm1, %v2697_v2  ;;  %2493 = vmatprep.mubr.msk.f32.mxu1 %vm2698_vm1, %v2697_v2 }
  0x3e   : > { %2475 = vmatpush3.msra.mxu0 %v283_v34  ;;  %2486 = vmatpush3.msra.mxu1 %v287_v35 }
  0x3f   : > { %2476 = vmatprep.subr.mxu0 %v2697_v2  ;;  %2487 = vmatprep.subr.mxu1 %v2697_v2 }
  0x40   : > { %2477 = vmatpush3.msra.mxu0 %v282_v36  ;;  %2488 = vmatpush3.msra.mxu1 %v286_v37 }
  0x41   : > { %2478 = vmatprep.subr.mxu0 %v2697_v2  ;;  %2489 = vmatprep.subr.mxu1 %v2697_v2 }
  0x42   : > { %2479 = vmatpush3.msra.mxu0 %v281_v38  ;;  %2490 = vmatpush3.msra.mxu1 %v285_v39 }
  0x43   : > { %2480 = vmatprep.subr.mxu0 %v2697_v2  ;;  %2491 = vmatprep.subr.mxu1 %v2697_v2 }
  0x44   : > { %2481 = vmatpush3.msra.mxu0 %v280_v40  ;;  %2492 = vmatpush3.msra.mxu1 %v284_v41 }
  0x45   : > { %2496 = vmatprep.subr.mxu0 %v2697_v2  ;;  %2507 = vmatprep.subr.mxu1 %v2697_v2 }
  0x46   : > { %2483 = vmatmul.mubr.msk.f32.vlgmr.msra.gmra.mxu0 %vm380_vm0, %v2818_v9  ;;  %2494 = vmatmul.mubr.msk.f32.vlgmr.msra.gmra.mxu1 %vm380_vm0, %v2818_v9 }
  0x47   : > { %2497 = vmatpush3.msra.mxu0 %v291_v42  ;;  %2508 = vmatpush3.msra.mxu1 %v295_v43 }
  0x48   : > { %2498 = vmatprep.subr.mxu0 %v2697_v2  ;;  %2509 = vmatprep.subr.mxu1 %v2697_v2 }
  0x49   : > { %2499 = vmatpush3.msra.mxu0 %v290_v44  ;;  %2510 = vmatpush3.msra.mxu1 %v294_v45 }
  0x4a   : > { %2500 = vmatprep.subr.mxu0 %v2697_v2  ;;  %2511 = vmatprep.subr.mxu1 %v2697_v2 }
  0x4b   : > { %2501 = vmatpush3.msra.mxu0 %v289_v46  ;;  %2512 = vmatpush3.msra.mxu1 %v293_v47 }
  0x4c   : > { %2502 = vmatprep.subr.mxu0 %v2697_v2  ;;  %2513 = vmatprep.subr.mxu1 %v2697_v2 }
  0x4d   : > { %2504 = vmatprep.mubr.msk.f32.mxu0 %vm2698_vm1, %v2697_v2  ;;  %2515 = vmatprep.mubr.msk.f32.mxu1 %vm2698_vm1, %v2697_v2 }
  0x4e   : > { %2503 = vmatpush3.msra.mxu0 %v288_v48  ;;  %2514 = vmatpush3.msra.mxu1 %v292_v49 }
  0x4f   : > { %2505 = vmatmul.mubr.msk.f32.vlgmr.msra.gmra.mxu0 %vm380_vm0, %v2818_v9  ;;  %2516 = vmatmul.mubr.msk.f32.vlgmr.msra.gmra.mxu1 %vm380_vm0, %v2818_v9 }
  0x50   : > { %2518 = vmatprep.subr.mxu0 %v2697_v2  ;;  %2523 = vmatprep.subr.mxu1 %v2697_v2 }
  0x51   : > { %2520 = vmatprep.mubr.msk.f32.mxu0 %vm2698_vm1, %v2697_v2  ;;  %2525 = vmatprep.mubr.msk.f32.mxu1 %vm2698_vm1, %v2697_v2 }
  0xdc   : > { %v450_v50 = vpop.f32.mrf.mxu0 }
  0xdd   : > { %v451_v5 = vadd.f32 %v2257_v62, %v450_v50 }
  0xde   : > { %v2396_v51 = vpop.f32.mrf.mxu0  ;;  %v520_v52 = vpop.f32.mrf.mxu1 }
  0xdf   : > { %v521_v6 = vadd.f32 %v2258_v63, %v520_v52 }
  0xe0   : > { %v2407_v53 = vpop.f32.mrf.mxu1 }
  0xe6   : > { %v590_v54 = vpop.f32.mrf.mxu0 }
  0xe7   : > { %v591_v17 = vadd.f32 %v2259_v11, %v590_v54 }
  0xe8   : > { %v2418_v55 = vpop.f32.mrf.mxu0  ;;  %v660_v56 = vpop.f32.mrf.mxu1 }
  0xe9   : > { %v661_v18 = vadd.f32 %v2260_v12, %v660_v56 }
  0xea   : > { %v2429_v57 = vpop.f32.mrf.mxu1 }
  0xf1   : > { %v730_v60 = vpop.f32.mrf.mxu0  ;;  %v800_v61 = vpop.f32.mrf.mxu1 }
  0xf2   : > { %v731_v0 = vadd.f32 %v2261_v58, %v730_v60  ;;  %v801_v1 = vadd.f32 %v2262_v59, %v800_v61 }
  0xf3   : > { %v2440_v3 = vpop.f32.mrf.mxu0  ;;  %v2451_v4 = vpop.f32.mrf.mxu1 }
  0xf4   : > { %2519 = vmatpush3.xpose.msk.msra.mxu0 %vm1225_vm2, %v731_v0  ;;  %2524 = vmatpush3.xpose.msk.msra.mxu1 %vm1225_vm2, %v801_v1 }
  0xf5   : > { %2528 = vmatprep.subr.mxu0 %v2697_v2  ;;  %2533 = vmatprep.subr.mxu1 %v2697_v2 }
  0xf7   : > { %2521 = vmatmul.mubr.msk.f32.vlgmr.msra.gmra.mxu0 %vm1225_vm2, %v451_v5  ;;  %2526 = vmatmul.mubr.msk.f32.vlgmr.msra.gmra.mxu1 %vm1225_vm2, %v521_v6 }
  0xf8   : > { %2530 = vmatprep.mubr.msk.f32.mxu0 %vm2698_vm1, %v2697_v2  ;;  %2535 = vmatprep.mubr.msk.f32.mxu1 %vm2698_vm1, %v2697_v2 }
  0xfb   : > { %v870_v9 = vpop.f32.mrf.mxu0  ;;  %v940_v10 = vpop.f32.mrf.mxu1 }
  0xfc   : > { %v871_v13 = vadd.f32 %v2263_v7, %v870_v9  ;;  %v941_v14 = vadd.f32 %v2264_v8, %v940_v10  ;;  %v2267_v8 = vld [vmem:[%s3191_s2 + $0xa] ss:$0 sm:$0xff] }
  0xfd   : > { %v2462_v15 = vpop.f32.mrf.mxu0  ;;  %v2473_v16 = vpop.f32.mrf.mxu1 }
  0xfe   : > { %2529 = vmatpush3.xpose.msk.msra.mxu0 %vm1225_vm2, %v871_v13  ;;  %2534 = vmatpush3.xpose.msk.msra.mxu1 %vm1225_vm2, %v941_v14  ;;  %v2268_v13 = vld [vmem:[%s3191_s2 + $0xb] ss:$0 sm:$0xff] }
  0xff   : > { %2538 = vmatprep.subr.mxu0 %v2697_v2  ;;  %2543 = vmatprep.subr.mxu1 %v2697_v2 }
 0x101   : > { %2531 = vmatmul.mubr.msk.f32.vlgmr.msra.gmra.mxu0 %vm1225_vm2, %v591_v17  ;;  %2536 = vmatmul.mubr.msk.f32.vlgmr.msra.gmra.mxu1 %vm1225_vm2, %v661_v18 }
 0x102   : > { %2540 = vmatprep.mubr.msk.f32.mxu0 %vm2698_vm1, %v2697_v2  ;;  %2545 = vmatprep.mubr.msk.f32.mxu1 %vm2698_vm1, %v2697_v2 }
 0x106   : > { %v1010_v21 = vpop.f32.mrf.mxu0  ;;  %v1080_v22 = vpop.f32.mrf.mxu1 }
 0x107   : > { %v1011_v23 = vadd.f32 %v2265_v19, %v1010_v21  ;;  %v1081_v24 = vadd.f32 %v2266_v20, %v1080_v22  ;;  %v1866_v21 = vld [vmem:[%s3192_s3] sm:$0xff]  ;;  %v1867_v22 = vld [vmem:[%s3192_s3 + $0x8] sm:$0xff] }
 0x108   : > { %v2484_v25 = vpop.f32.mrf.mxu0  ;;  %v2495_v26 = vpop.f32.mrf.mxu1 }
 0x109   : > { %2539 = vmatpush3.msra.mxu0 %v1011_v23  ;;  %2544 = vmatpush3.msra.mxu1 %v1081_v24  ;;  %v1868_v23 = vld [vmem:[%s3192_s3 + $0x10] sm:$0xff]  ;;  %v1869_v26 = vld [vmem:[%s3192_s3 + $0x18] sm:$0xff] }
 0x10a   : > { %2548 = vmatprep.subr.mxu0 %v2697_v2  ;;  %2553 = vmatprep.subr.mxu1 %v2697_v2 }
 0x10f   : > { %v3088_v27 = vpop.f32.mrf.mxu0  ;;  %v3090_v28 = vpop.f32.mrf.mxu1 }
 0x110   : > { %v1151_v12 = vadd.f32 %v2267_v8, %v3088_v27  ;;  %v1221_v16 = vadd.f32 %v2268_v13, %v3090_v28 }
 0x111   : > { %v2506_v29 = vpop.f32.mrf.mxu0  ;;  %v2517_v30 = vpop.f32.mrf.mxu1 }
 0x1b7   : > { %v1298_v32 = vpop.f32.mrf.mxu0  ;;  %v1374_v33 = vpop.f32.mrf.mxu1 }
 0x1b8   : > { %v1299_v34 = vadd.f32 %v1298_v32, %v1224_v31  ;;  %v1375_v37 = vadd.f32 %v1374_v33, %v1224_v31 }
 0x1b9   : > { %v2522_v35 = vpop.f32.mrf.mxu0  ;;  %v2527_v36 = vpop.f32.mrf.mxu1 }
 0x1ba   : > { %v1530_v38 = vsel %vm1225_vm2, %v1299_v34, -inf  ;;  %v1533_v39 = vsel %vm1225_vm2, %v1375_v37, -inf }
 0x1bb   : > { %1531 = vmax.xlane.f32.xlu0 %v1530_v38 }
 0x1bf   : > { %1534 = vmax.xlane.f32.xlu0 %v1533_v39 }
 0x1c1   : > { %v1526_v40 = vpop.f32.mrf.mxu1  ;;  %v1450_v41 = vpop.f32.mrf.mxu0 }
 0x1c2   : > { %v1451_v42 = vadd.f32 %v1450_v41, %v1224_v31  ;;  %v1527_v45 = vadd.f32 %v1526_v40, %v1224_v31 }
 0x1c3   : > { %v2532_v43 = vpop.f32.mrf.mxu0  ;;  %v2537_v44 = vpop.f32.mrf.mxu1 }
 0x1c4   : > { %v1536_v46 = vsel %vm1225_vm2, %v1451_v42, -inf  ;;  %v1539_v47 = vsel %vm1225_vm2, %v1527_v45, -inf }
 0x1c5   : > { %1537 = vmax.xlane.f32.xlu1 %v1536_v46 }
 0x1c9   : > { %1540 = vmax.xlane.f32.xlu1 %v1539_v47 }
 0x244   : > { %v1532_v48 = vpop.xlane.xlu0 %1531 }
 0x245   : > { %v1542_v49 = vsub.f32 %v1299_v34, %v1532_v48 }
 0x247   : > { %v1546_v50 = vmul.f32 1.442695, %v1542_v49 }
 0x248   : > { %v1535_v51 = vpop.xlane.xlu0 %1534 }
 0x249   : > { %2619 = vpow2.f32 %v1546_v50  ;;  %v1543_v52 = vsub.f32 %v1375_v37, %v1535_v51 }
 0x24b   : > { %v1548_v53 = vmul.f32 1.442695, %v1543_v52 }
 0x24d   : > { %2621 = vpow2.f32 %v1548_v53 }
 0x24e   : > { %v1538_v54 = vpop.xlane.xlu1 %1537 }
 0x24f   : > { %v1544_v55 = vsub.f32 %v1451_v42, %v1538_v54 }
 0x251   : > { %v1550_v56 = vmul.f32 1.442695, %v1544_v55 }
 0x252   : > { %v1541_v57 = vpop.xlane.xlu1 %1540 }
 0x253   : > { %2623 = vpow2.f32 %v1550_v56  ;;  %v1545_v58 = vsub.f32 %v1527_v45, %v1541_v57  ;;  %v2297_v45 = vld [vmem:[%s3193_s4] ss:$0 sm:$0xff] }
 0x255   : > { %v1552_v59 = vmul.f32 1.442695, %v1545_v58 }
 0x256   : > { %v2620_v60 = vpop.eup %2619 }
 0x257   : > { %2625 = vpow2.f32 %v1552_v59  ;;  %v1554_v61 = vsel %vm1225_vm2, %v2620_v60, 0.0 }
 0x258   : > { %1555 = vadd.xlane.f32.xlu0 %v1554_v61 }
 0x25a   : > { %v2622_v62 = vpop.eup %2621 }
 0x25b   : > { %v1557_v63 = vsel %vm1225_vm2, %v2622_v62, 0.0 }
 0x25c   : > { %1558 = vadd.xlane.f32.xlu1 %v1557_v63 }
 0x260   : > { %v2624_v0 = vpop.eup %2623 }
 0x261   : > { %v1560_v1 = vsel %vm1225_vm2, %v2624_v0, 0.0 }
 0x262   : > { %1561 = vadd.xlane.f32.xlu0 %v1560_v1 }
 0x264   : > { %v2626_v3 = vpop.eup %2625 }
 0x265   : > { %v1563_v4 = vsel %vm1225_vm2, %v2626_v3, 0.0 }
 0x266   : > { %1564 = vadd.xlane.f32.xlu1 %v1563_v4 }
 0x2e1   : > { %v1556_v5 = vpop.xlane.xlu0 %1555 }
 0x2e2   : > { %2627 = vrcp.f32 %v1556_v5 }
 0x2e5   : > { %v1559_v6 = vpop.xlane.xlu1 %1558 }
 0x2e6   : > { %2629 = vrcp.f32 %v1559_v6 }
 0x2eb   : > { %v1562_v7 = vpop.xlane.xlu0 %1561 }
 0x2ec   : > { %2631 = vrcp.f32 %v1562_v7 }
 0x2ef   : > { %v2628_v9 = vpop.eup %2627  ;;  %v1565_v10 = vpop.xlane.xlu1 %1564 }
 0x2f0   : > { %2633 = vrcp.f32 %v1565_v10  ;;  %v1570_v11 = vmul.f32 %v2628_v9, %v2620_v60 }
 0x2f2   : > { %2541 = vmatmul.mubr.msk.f32.vlgmr.msra.gmra.mxu0 %vm1225_vm2, %v1570_v11 }
 0x2f3   : > { %v2630_v14 = vpop.eup %2629  ;;  %2549 = vmatpush3.msra.mxu0 %v1151_v12  ;;  %2550 = vmatprep.mubr.msk.f32.mxu0 %vm2698_vm1, %v2697_v2 }
 0x2f4   : > { %v1571_v15 = vmul.f32 %v2630_v14, %v2622_v62  ;;  %2558 = vmatprep.subr.mxu0 %v2697_v2 }
 0x2f6   : > { %2546 = vmatmul.mubr.msk.f32.vlgmr.msra.gmra.mxu1 %vm1225_vm2, %v1571_v15 }
 0x2f7   : > { %2554 = vmatpush3.msra.mxu1 %v1221_v16  ;;  %2555 = vmatprep.mubr.msk.f32.mxu1 %vm2698_vm1, %v2697_v2 }
 0x2f8   : > { %2563 = vmatprep.subr.mxu1 %v2697_v2 }
 0x2f9   : > { %v2632_v17 = vpop.eup %2631 }
 0x2fa   : > { %v1572_v18 = vmul.f32 %v2632_v17, %v2624_v0 }
 0x2fc   : > { %2551 = vmatmul.mubr.msk.f32.vlgmr.msra.gmra.mxu0 %vm1225_vm2, %v1572_v18 }
 0x2fd   : > { %v2634_v19 = vpop.eup %2633  ;;  %2560 = vmatprep.mubr.msk.f32.mxu0 %vm2698_vm1, %v2697_v2  ;;  %2559 = vmatpush3.msra.mxu0 %v1866_v21 }
 0x2fe   : > { %v1573_v20 = vmul.f32 %v2634_v19, %v2626_v3  ;;  %2568 = vmatprep.subr.mxu0 %v2697_v2 }
 0x300   : > { %2556 = vmatmul.mubr.msk.f32.vlgmr.msra.gmra.mxu1 %vm1225_vm2, %v1573_v20 }
 0x301   : > { %2565 = vmatprep.mubr.msk.f32.mxu1 %vm2698_vm1, %v2697_v2  ;;  %2564 = vmatpush3.msra.mxu1 %v1867_v22 }
 0x302   : > { %2573 = vmatprep.subr.mxu1 %v2697_v2 }
 0x3b2   : > { %v1643_v24 = vpop.f32.mrf.mxu0 }
 0x3b3   : > { %2561 = vmatmul.mubr.msk.f32.vlgmr.msra.gmra.mxu0 %vm1225_vm2, %v1643_v24 }
 0x3b4   : > { %v2542_v25 = vpop.f32.mrf.mxu0  ;;  %2569 = vmatpush3.msra.mxu0 %v1868_v23  ;;  %2570 = vmatprep.mubr.msk.f32.mxu0 %vm2698_vm1, %v2697_v2 }
 0x3b6   : > { %v1716_v27 = vpop.f32.mrf.mxu1 }
 0x3b7   : > { %2566 = vmatmul.mubr.msk.f32.vlgmr.msra.gmra.mxu1 %vm1225_vm2, %v1716_v27 }
 0x3b8   : > { %v2547_v28 = vpop.f32.mrf.mxu1  ;;  %2574 = vmatpush3.msra.mxu1 %v1869_v26  ;;  %2575 = vmatprep.mubr.msk.f32.mxu1 %vm2698_vm1, %v2697_v2 }
 0x3bc   : > { %v1789_v29 = vpop.f32.mrf.mxu0 }
 0x3bd   : > { %2571 = vmatmul.mubr.msk.f32.vlgmr.msra.gmra.mxu0 %vm1225_vm2, %v1789_v29 }
 0x3be   : > { %v2552_v30 = vpop.f32.mrf.mxu0 }
 0x3c0   : > { %v1862_v31 = vpop.f32.mrf.mxu1 }
 0x3c1   : > { %2576 = vmatmul.mubr.msk.f32.vlgmr.msra.gmra.mxu1 %vm1225_vm2, %v1862_v31 }
 0x3c2   : > { %v2557_v32 = vpop.f32.mrf.mxu1 }
 0x473   : > { %v1939_v33 = vpop.f32.mrf.mxu0 }
 0x474   : > { %v2162_v2 = vsel %vm380_vm0, %v1939_v33, 0.0 }
 0x475   : > { %v2562_v34 = vpop.f32.mrf.mxu0 }
 0x477   : > { %v2012_v35 = vpop.f32.mrf.mxu1 }
 0x478   : > { %v2163_v37 = vsel %vm380_vm0, %v2012_v35, 0.0 }
 0x479   : > { %v2567_v36 = vpop.f32.mrf.mxu1  ;;  %v2164_v40 = vadd.f32 %v2163_v37, %v2162_v2 }
 0x47d   : > { %v2085_v38 = vpop.f32.mrf.mxu0 }
 0x47e   : > { %v2165_v39 = vsel %vm380_vm0, %v2085_v38, 0.0 }
 0x47f   : > { %v2572_v41 = vpop.f32.mrf.mxu0  ;;  %v2166_v42 = vadd.f32 %v2165_v39, %v2164_v40 }
 0x481   : > { %v2158_v43 = vpop.f32.mrf.mxu1 }
 0x482   : > { %v2167_v44 = vsel %vm380_vm0, %v2158_v43, 0.0 }
 0x483   : > { %v2168_v46 = vadd.f32 %v2167_v44, %v2166_v42  ;;  %v2577_v47 = vpop.f32.mrf.mxu1 }
 0x485   : > { %v2176_v48 = vadd.f32 %v2297_v45, %v2168_v46 }
 0x487   : > { %2177 = vst.msk [vmem:[%s242_s14] sm:$0xff] %vm380_vm0, %v2176_v48 }
 0x488   : > { %2648 = shalt.err (!%p2645_p3)
}
 0x489   : > { %s2649_s29 = scalar_lea.hbm %s2190_s18, 128  ;;  %s2653_s11 = scalar_lea.hbm %s3195_s6, 256 }
 0x48a   : > { %p2650_p4 = scmp.ne.s32.totalorder %s2190_s18, %s2649_s29  ;;  %p2654_p9 = scmp.lt.s32.totalorder %s2190_s18, %s3195_s6 }
 0x48b   : > { %p2655_p10 = scmp.lt.s32.totalorder %s2653_s11, %s2649_s29 }
 0x48c   : > { %p2651_p7 = pnand %p2650_p4, %p2773_p5 }
 0x48d   : > { %p2656_p11 = por %p2655_p10, %p2654_p9 }
 0x48e   : > { %p2652_p8 = pneg %p2651_p7 }
 0x490   : > { %p2657_p12 = pnand %p2656_p11, %p2652_p8 }
 0x492   : > { %2660 = shalt.err (!%p2657_p12)
}
 0x493   : > { %2578 = dma.vmem_to_hbm [thread:$0]  (%p2773_p5), %s2193_s15, 128, %s2190_s18, %s2179_s19  }
 0x494 PF: > { %p2584_p13 = scmp.ge.s32.totalorder %s2695_s24, 2  ;;  %s2204_s14 = sand.u32 1, %s2683_s21  }
 0x495   : > { %s2205_s16 = scalar_lea.sflag [#allocation3], %s2204_s14 }
 0x496   : > { %p2581_p0 = pnand %p2584_p13, %p2777_p6 }
 0x498   : > { %p2582_p1 = pneg %p2581_p0 }
 0x49a   : > { %2678 = dma.done.wait (%p2582_p1), %s2205_s16, 128  }
 0x49b   : > { %2680 = vsyncadd (%p2582_p1), %s2205_s16, 4294967168  ;;  %p16_p2 = scmp.ge.s32.totalorder %s2760_s27, 4   ;;  %s3198_s21 = smov %s2687_s22 }
 0x49c   : > { %s3199_s22 = smov %s2691_s23  ;;  %s3200_s23 = smov %s2771_s30 }
 0x49d   : > { %s3201_s24 = smov %s2760_s27  ;;  %18 = sbr.rel (!%p16_p2) target bundleno = 3 (0x3), region = 79 }
 0x4a2   :  { %2210 = vsyncpa [#allocation3], 1 }
 0x4a3   :  { %2212 = vsyncpa [#allocation3 + $0x1], 1 }

</bundles_post_ra>
